<compile_context>
chip_gen: v5e
topology: v5e:2x2
jax: 0.10.0
libtpu: 0.0.40
codegen_flags: <defaults>
</compile_context>

<pallas_src>
import functools

import jax
import jax.numpy as jnp
from jax.experimental import pallas as pl
from jax.experimental.pallas import tpu as pltpu


def _round_up(x, m):
    return ((x + m - 1) // m) * m


def _highway_kernel(x_ref, wn_ref, wg_ref, b_ref, o_ref, *scratch,
                    matmul_dtype, weights_resident):
    """Grid = (row_tiles, num_layers).

    x_ref  : (TM, Dp)                input rows (consumed at layer 0 only)
    wn_ref : (L or 1, Dp, Dp)        nonlinear-branch weights (matmul_dtype)
    wg_ref : (L or 1, Dp, Dp)        gate-branch weights (matmul_dtype)
    b_ref  : (L or 1, 2, Dp) f32     row 0 = nonlinear bias, row 1 = gate bias
    o_ref  : (TM, Dp)                output rows
    scratch: optional (TM, Dp) f32 accumulator (only when o_ref is not f32)
    """
    l = pl.program_id(1)
    last = pl.num_programs(1) - 1
    acc_ref = scratch[0] if scratch else o_ref   # activation across layers

    @pl.when(l == 0)
    def _():
        acc_ref[...] = x_ref[...].astype(acc_ref.dtype)

    x = acc_ref[...].astype(jnp.float32)          # (TM, Dp) f32

    if weights_resident:
        wn = wn_ref[l]                            # (Dp, Dp), pre-cast
        wg = wg_ref[l]
        bias = b_ref[l]                           # (2, Dp) f32
    else:
        wn = wn_ref[0]
        wg = wg_ref[0]
        bias = b_ref[0]

    xm = x.astype(matmul_dtype)
    # Two MXU matmuls, f32 accumulation.
    nl = jnp.dot(xm, wn, preferred_element_type=jnp.float32) + bias[0:1, :]
    gl = jnp.dot(xm, wg, preferred_element_type=jnp.float32) + bias[1:2, :]

    relu_nl = jnp.maximum(nl, 0.0)
    gate = jax.nn.sigmoid(gl)                     # EUP exp path
    # gate*x + (1-gate)*relu_nl  ==  relu_nl + gate*(x - relu_nl)
    new_x = relu_nl + gate * (x - relu_nl)

    if scratch:
        @pl.when(l != last)
        def _():
            acc_ref[...] = new_x

        @pl.when(l == last)
        def _():
            o_ref[...] = new_x.astype(o_ref.dtype)
    else:
        acc_ref[...] = new_x                      # o_ref is the accumulator


def pack_highway_params(params, *, matmul_dtype=jnp.bfloat16):
    """Build padded, pre-cast weight stacks once (hoisted out of forward).

    params: list of (w (D, 2D), b (2D,)) per layer (w already transposed
    relative to torch's (2D, D) Linear weight).
    """
    L = len(params)
    D = params[0][0].shape[0]
    Dp = _round_up(D, 128)

    wn = jnp.stack([w[:, :D] for (w, _) in params])                  # (L, D, D)
    wg = jnp.stack([w[:, D:] for (w, _) in params])                  # (L, D, D)
    b = jnp.stack([jnp.stack([bb[:D], bb[D:]]) for (_, bb) in params])  # (L, 2, D)

    wn_p = jnp.zeros((L, Dp, Dp), matmul_dtype).at[:, :D, :D].set(
        wn.astype(matmul_dtype))
    wg_p = jnp.zeros((L, Dp, Dp), matmul_dtype).at[:, :D, :D].set(
        wg.astype(matmul_dtype))
    b_p = jnp.zeros((L, 2, Dp), jnp.float32).at[:, :, :D].set(
        b.astype(jnp.float32))

    return dict(wn=wn_p, wg=wg_p, b=b_p, D=D, L=L, Dp=Dp,
                matmul_dtype=matmul_dtype)


def _choose_row_tile(M, row_tile):
    Mp8 = _round_up(max(M, 1), 8)
    tm = min(_round_up(row_tile, 8), Mp8)
    # Keep >= 2 row tiles when there's enough work so the "parallel" row axis
    # can actually shard across both TensorCores on v7x (megacore).
    if tm >= Mp8 and Mp8 >= 128:
        tm = _round_up((Mp8 + 1) // 2, 8)
    return tm


def _vmem_limit_bytes(TM, Dp, L, resident, use_scratch,
                      w_itemsize, x_itemsize, out_itemsize):
    nblk = L if resident else 1
    weight = 2 * 2 * nblk * Dp * Dp * w_itemsize   # wn+wg, double-buffered
    bias = 2 * nblk * 8 * Dp * 4                   # sublane-padded, 2 buffers
    x_b = 2 * TM * Dp * x_itemsize
    o_b = 2 * TM * Dp * out_itemsize
    acc = TM * Dp * 4 if use_scratch else 0
    needed = weight + bias + x_b + o_b + acc + (4 << 20)   # + margin
    try:
        cap = pltpu.get_tpu_info().vmem_capacity_bytes
    except Exception:
        cap = 64 << 20          # conservative (v7x per-TC VMEM)
    return int(min(max(needed, 32 << 20), int(cap * 0.9)))


def highway_forward(x, packed, *, row_tile=512):
    """x: (..., D). packed: output of pack_highway_params. Returns (..., D)."""
    D, L, Dp = packed["D"], packed["L"], packed["Dp"]
    matmul_dtype = packed["matmul_dtype"]
    assert x.shape[-1] == D

    orig_shape = x.shape
    xf = x.reshape(-1, D)
    M = xf.shape[0]

    TM = _choose_row_tile(M, row_tile)
    Mp = _round_up(M, TM)

    # Zero-pad activations; pad *columns* stay zero through every layer
    # (zero W/b columns -> gate=0.5 times zero). Pad *rows* are junk after a
    # layer but never mix with real rows and are discarded below.
    xf_p = jnp.zeros((Mp, Dp), x.dtype).at[:M, :D].set(xf)

    # Whole weight stack small enough to keep resident in VMEM for the grid?
    w_itemsize = jnp.dtype(matmul_dtype).itemsize
    weights_resident = (2 * L * Dp * Dp * w_itemsize) <= (8 << 20)

    use_scratch = x.dtype != jnp.float32   # else accumulate directly in o_ref

    if weights_resident:
        w_spec = pl.BlockSpec((L, Dp, Dp), lambda i, l: (0, 0, 0))
        b_spec = pl.BlockSpec((L, 2, Dp), lambda i, l: (0, 0, 0))
    else:
        w_spec = pl.BlockSpec((1, Dp, Dp), lambda i, l: (l, 0, 0))
        b_spec = pl.BlockSpec((1, 2, Dp), lambda i, l: (l, 0, 0))

    kernel = functools.partial(_highway_kernel,
                               matmul_dtype=matmul_dtype,
                               weights_resident=weights_resident)

    vmem_limit = _vmem_limit_bytes(
        TM, Dp, L, weights_resident, use_scratch,
        w_itemsize, jnp.dtype(x.dtype).itemsize, jnp.dtype(x.dtype).itemsize)

    out = pl.pallas_call(
        kernel,
        out_shape=jax.ShapeDtypeStruct((Mp, Dp), x.dtype),
        grid_spec=pltpu.PrefetchScalarGridSpec(
            num_scalar_prefetch=0,
            grid=(Mp // TM, L),          # layer axis last (inner)
            in_specs=[
                # x tile: index independent of l -> fetched once per row tile.
                pl.BlockSpec((TM, Dp), lambda i, l: (i, 0)),
                w_spec,                  # nonlinear-branch weights
                w_spec,                  # gate-branch weights
                b_spec,                  # merged biases
            ],
            out_specs=pl.BlockSpec((TM, Dp), lambda i, l: (i, 0)),
            scratch_shapes=(
                [pltpu.VMEM((TM, Dp), jnp.float32)] if use_scratch else []),
        ),
        compiler_params=pltpu.CompilerParams(
            dimension_semantics=("parallel", "arbitrary"),
            vmem_limit_bytes=vmem_limit),
    )(xf_p, packed["wn"], packed["wg"], packed["b"])

    return out[:M, :D].reshape(orig_shape)


def init_highway_params(key, input_dim, num_layers):
    """Deterministic init matching torch.nn.Linear(input_dim, 2*input_dim),
    with bias[input_dim:] filled with 1 (as in the module __init__)."""
    params = []
    bound = 1.0 / jnp.sqrt(input_dim)
    for _ in range(num_layers):
        key, kw, kb = jax.random.split(key, 3)
        # torch Linear weight: (2D, D); we store transposed (D, 2D).
        w = jax.random.uniform(kw, (2 * input_dim, input_dim),
                               minval=-bound, maxval=bound,
                               dtype=jnp.float32).T
        b = jax.random.uniform(kb, (2 * input_dim,),
                               minval=-bound, maxval=bound,
                               dtype=jnp.float32)
        b = b.at[input_dim:].set(1.0)
        params.append((w, b))
    return params


def highway_reference(x, params):
    """Pure-JAX reference mirroring the PyTorch forward."""
    cur = x
    for (w, b) in params:
        proj = cur @ w + b
        D = cur.shape[-1]
        nonlinear, gate_logits = proj[..., :D], proj[..., D:]
        nonlinear = jnp.maximum(nonlinear, 0.0)
        gate = jax.nn.sigmoid(gate_logits)
        cur = gate * cur + (1.0 - gate) * nonlinear
    return cur


if __name__ == "__main__":
    key = jax.random.PRNGKey(0)
    k_x, k_p, k_x2, k_p2 = jax.random.split(key, 4)

    # Config 1: (batch, seq, input_dim) consistent with the char-embedding use.
    batch, seq, input_dim, num_layers = 2, 8, 32, 2
    x = jax.random.normal(k_x, (batch, seq, input_dim), dtype=jnp.float32)
    params = init_highway_params(k_p, input_dim, num_layers)
    ref = highway_reference(x, params)

    # Default bf16-MXU path (pre-cast, resident weights).
    packed_bf16 = pack_highway_params(params)
    out = jax.block_until_ready(highway_forward(x, packed_bf16))
    assert out.shape == x.shape and out.dtype == x.dtype
    assert jnp.allclose(out, ref, atol=5e-2, rtol=5e-2), "bf16 mismatch"

    # f32-MXU path: tight tolerance vs reference.
    packed_f32 = pack_highway_params(params, matmul_dtype=jnp.float32)
    out_f32 = jax.block_until_ready(highway_forward(x, packed_f32))
    assert jnp.allclose(out_f32, ref, atol=1e-5, rtol=1e-5), "f32 mismatch"

    # bf16 activations exercise the f32 VMEM-scratch accumulator path.
    x_bf = x.astype(jnp.bfloat16)
    out_bf = jax.block_until_ready(highway_forward(x_bf, packed_bf16))
    assert out_bf.dtype == jnp.bfloat16
    ref_bf = highway_reference(x_bf.astype(jnp.float32), params)
    assert jnp.allclose(out_bf.astype(jnp.float32), ref_bf,
                        atol=5e-2, rtol=5e-2), "bf16-activation mismatch"

    # Config 2: multiple row tiles + row/lane padding
    # (M = 4*80 = 320 rows -> two 160-row tiles, D=48 -> Dp=128, 3 layers).
    x2 = jax.random.normal(k_x2, (4, 80, 48), dtype=jnp.float32)
    params2 = init_highway_params(k_p2, 48, 3)
    ref2 = highway_reference(x2, params2)

    out2 = jax.block_until_ready(
        highway_forward(x2, pack_highway_params(params2)))
    assert out2.shape == x2.shape
    assert jnp.allclose(out2, ref2, atol=5e-2, rtol=5e-2), "tiled bf16 mismatch"

    out2_f32 = jax.block_until_ready(
        highway_forward(x2, pack_highway_params(params2,
                                                matmul_dtype=jnp.float32)))
    assert jnp.allclose(out2_f32, ref2, atol=1e-5, rtol=1e-5), "tiled f32 mismatch"

    print("KERNEL_OK")
</pallas_src>

<mosaic_0001>
module attributes {stable_mosaic.version = 11 : i64} {
  func.func @_highway_kernel(%arg0: i32, %arg1: i32, %arg2: memref<16x128xf32, #tpu.memory_space<vmem>>, %arg3: memref<2x128x128xbf16, #tpu.memory_space<vmem>>, %arg4: memref<2x128x128xbf16, #tpu.memory_space<vmem>>, %arg5: memref<2x2x128xf32, #tpu.memory_space<vmem>>, %arg6: memref<16x128xf32, #tpu.memory_space<vmem>>) attributes {dimension_semantics = [#tpu.dimension_semantics<parallel>, #tpu.dimension_semantics<arbitrary>], iteration_bounds = array<i64: 1, 2>, scalar_prefetch = 0 : i64, scratch_operands = 0 : i64, tpu.core_type = #tpu.core_type<tc>, window_params = [{transform_indices = @transform_0, window_bounds = array<i64: 16, 128>}, {pipeline_mode = #tpu.pipeline_mode<synchronous>, transform_indices = @transform_1, window_bounds = array<i64: 2, 128, 128>}, {pipeline_mode = #tpu.pipeline_mode<synchronous>, transform_indices = @transform_2, window_bounds = array<i64: 2, 128, 128>}, {pipeline_mode = #tpu.pipeline_mode<synchronous>, transform_indices = @transform_3, window_bounds = array<i64: 2, 2, 128>}, {transform_indices = @transform_4, window_bounds = array<i64: 16, 128>}]} {
    %c0_i32 = arith.constant 0 : i32
    %0 = arith.cmpi eq, %arg1, %c0_i32 : i32
    %1 = arith.extui %0 : i1 to i32
    %c0_i32_0 = arith.constant 0 : i32
    %2 = arith.cmpi ne, %1, %c0_i32_0 : i32
    scf.if %2 {
      %c0_13 = arith.constant 0 : index
      %c0_14 = arith.constant 0 : index
      %33 = vector.load %arg2[%c0_13, %c0_14] : memref<16x128xf32, #tpu.memory_space<vmem>>, vector<16x128xf32>
      %c0_15 = arith.constant 0 : index
      %c0_16 = arith.constant 0 : index
      %34 = vector.load %arg6[%c0_15, %c0_16] : memref<16x128xf32, #tpu.memory_space<vmem>>, vector<16x128xf32>
      tpu.vector_store %arg6[%c0_15, %c0_16], %33 {strides = array<i32>} : memref<16x128xf32, #tpu.memory_space<vmem>>, vector<16x128xf32>,
    } else {
    }
    %c0 = arith.constant 0 : index
    %c0_1 = arith.constant 0 : index
    %3 = vector.load %arg6[%c0, %c0_1] : memref<16x128xf32, #tpu.memory_space<vmem>>, vector<16x128xf32>
    %4 = arith.index_cast %arg1 : i32 to index
    %c0_2 = arith.constant 0 : index
    %c0_3 = arith.constant 0 : index
    %5 = vector.load %arg3[%4, %c0_2, %c0_3] : memref<2x128x128xbf16, #tpu.memory_space<vmem>>, vector<1x128x128xbf16>
    %6 = vector.shape_cast %5 : vector<1x128x128xbf16> to vector<128x128xbf16>
    %7 = arith.index_cast %arg1 : i32 to index
    %c0_4 = arith.constant 0 : index
    %c0_5 = arith.constant 0 : index
    %8 = vector.load %arg4[%7, %c0_4, %c0_5] : memref<2x128x128xbf16, #tpu.memory_space<vmem>>, vector<1x128x128xbf16>
    %9 = vector.shape_cast %8 : vector<1x128x128xbf16> to vector<128x128xbf16>
    %10 = arith.index_cast %arg1 : i32 to index
    %c0_6 = arith.constant 0 : index
    %c0_7 = arith.constant 0 : index
    %11 = vector.load %arg5[%10, %c0_6, %c0_7] : memref<2x2x128xf32, #tpu.memory_space<vmem>>, vector<1x2x128xf32>
    %12 = vector.shape_cast %11 : vector<1x2x128xf32> to vector<2x128xf32>
    %13 = arith.truncf %3 : vector<16x128xf32> to vector<16x128xbf16>
    %cst = arith.constant dense<0.000000e+00> : vector<16x128xf32>
    %14 = tpu.matmul %13, %6, %cst {dimension_numbers = #tpu.dot_dimension_numbers<[1], [0], [0], [1], [0, 0, 1, 1], [], []>} : vector<16x128xbf16>, vector<128x128xbf16>, vector<16x128xf32> -> vector<16x128xf32>
    %15 = vector.extract_strided_slice %12 {offsets = [0, 0], sizes = [1, 128], strides = [1, 1]} : vector<2x128xf32> to vector<1x128xf32>
    %16 = vector.broadcast %15 : vector<1x128xf32> to vector<16x128xf32>
    %17 = arith.addf %14, %16 : vector<16x128xf32>
    %cst_8 = arith.constant dense<0.000000e+00> : vector<16x128xf32>
    %18 = tpu.matmul %13, %9, %cst_8 {dimension_numbers = #tpu.dot_dimension_numbers<[1], [0], [0], [1], [0, 0, 1, 1], [], []>} : vector<16x128xbf16>, vector<128x128xbf16>, vector<16x128xf32> -> vector<16x128xf32>
    %19 = vector.extract_strided_slice %12 {offsets = [1, 0], sizes = [1, 128], strides = [1, 1]} : vector<2x128xf32> to vector<1x128xf32>
    %20 = vector.broadcast %19 : vector<1x128xf32> to vector<16x128xf32>
    %21 = arith.addf %18, %20 : vector<16x128xf32>
    %cst_9 = arith.constant 0.000000e+00 : f32
    %22 = vector.broadcast %cst_9 : f32 to vector<16x128xf32>
    %23 = arith.maximumf %17, %22 : vector<16x128xf32>
    %24 = arith.negf %21 : vector<16x128xf32>
    %25 = math.exp %24 : vector<16x128xf32>
    %cst_10 = arith.constant 1.000000e+00 : f32
    %26 = vector.broadcast %cst_10 : f32 to vector<16x128xf32>
    %27 = arith.addf %26, %25 : vector<16x128xf32>
    %28 = arith.divf %26, %27 : vector<16x128xf32>
    %29 = arith.subf %3, %23 : vector<16x128xf32>
    %30 = arith.mulf %28, %29 : vector<16x128xf32>
    %31 = arith.addf %23, %30 : vector<16x128xf32>
    %c0_11 = arith.constant 0 : index
    %c0_12 = arith.constant 0 : index
    %32 = vector.load %arg6[%c0_11, %c0_12] : memref<16x128xf32, #tpu.memory_space<vmem>>, vector<16x128xf32>
    tpu.vector_store %arg6[%c0_11, %c0_12], %31 {strides = array<i32>} : memref<16x128xf32, #tpu.memory_space<vmem>>, vector<16x128xf32>,
    return
  }
  func.func @transform_0(%arg0: i32, %arg1: i32) -> (i32, i32) {
    %c0_i32 = arith.constant 0 : i32
    %c0_i32_0 = arith.constant 0 : i32
    return %arg0, %c0_i32 : i32, i32
  }
  func.func @transform_1(%arg0: i32, %arg1: i32) -> (i32, i32, i32) {
    %c0_i32 = arith.constant 0 : i32
    %c0_i32_0 = arith.constant 0 : i32
    %c0_i32_1 = arith.constant 0 : i32
    %c0_i32_2 = arith.constant 0 : i32
    return %c0_i32, %c0_i32_0, %c0_i32_1 : i32, i32, i32
  }
  func.func @transform_2(%arg0: i32, %arg1: i32) -> (i32, i32, i32) {
    %c0_i32 = arith.constant 0 : i32
    %c0_i32_0 = arith.constant 0 : i32
    %c0_i32_1 = arith.constant 0 : i32
    %c0_i32_2 = arith.constant 0 : i32
    return %c0_i32, %c0_i32_0, %c0_i32_1 : i32, i32, i32
  }
  func.func @transform_3(%arg0: i32, %arg1: i32) -> (i32, i32, i32) {
    %c0_i32 = arith.constant 0 : i32
    %c0_i32_0 = arith.constant 0 : i32
    %c0_i32_1 = arith.constant 0 : i32
    %c0_i32_2 = arith.constant 0 : i32
    return %c0_i32, %c0_i32_0, %c0_i32_1 : i32, i32, i32
  }
  func.func @transform_4(%arg0: i32, %arg1: i32) -> (i32, i32) {
    %c0_i32 = arith.constant 0 : i32
    %c0_i32_0 = arith.constant 0 : i32
    return %arg0, %c0_i32 : i32, i32
  }
}

</mosaic_0001>

<bundles_post_ra>
// kernel: tpu_custom_call.1
= control target key start
LH: loop header
LB: loop body
LE: loop exit
PB: predicated region body
PF: predicated region fallthrough
CT: control target
= control target key end

     0   :  { %9 = vsyncpa [#allocation3], 0  ;;  %s1106_s0 = inlined_call_operand.hbm [shape: f32[16,128], index: 0, kind: input, shape index: {}]   ;;  %s1107_s1 = inlined_call_operand.hbm [shape: bf16[2,128,128], index: 1, kind: input, shape index: {}]   ;;  %s1108_s2 = inlined_call_operand.hbm [shape: bf16[2,128,128], index: 2, kind: input, shape index: {}]   ;;  %s1109_s3 = inlined_call_operand.hbm [shape: f32[2,2,128], index: 3, kind: input, shape index: {}]   ;;  %s1110_s4 = inlined_call_operand.hbm [shape: f32[16,128], index: 4, kind: output, shape index: {}]  }
   0x1   :  { %10 = vsyncpa [#allocation6], 0 }
   0x2   :  { %11 = vsyncpa [#allocation9], 0 }
   0x3   :  { %12 = vsyncpa [#allocation4], 0  ;;  %s1002_s15 = smov 0   ;;  %s1004_s16 = smov 0  }
   0x4   :  { %s1006_s17 = smov 0  }
   0x5 LB: > { %s178_s20 = sshll.u32 %s1107_s1, 4  ;;  %s584_s21 = sadd.s32 4294967295, %s962_s17   ;;  %s962_s17 = sphi %s1006_s17, %s18_s17   ;;  %s958_s16 = sphi %s1004_s16, %s1115_s16   ;;  %s954_s15 = sphi %s1002_s15, %s1114_s15   ;;  %s179_s20 = int_to_ptr.hbm [resolvable:$true] %s178_s20 }
   0x6   : > { %p585_p0 = scmp.ge.s32.totalorder %s962_s17, 1  ;;  %p150_p1 = scmp.lt.s32.totalorder %s962_s17, 3 }
   0x7   : > { %p1025_p2 = scmp.eq.s32.totalorder %s584_s21, 0  ;;  %s964_s24 = smov [#allocation5]  }
   0x8   : > { %p1029_p3 = pnand %p585_p0, %p150_p1  ;;  %s180_s25 = sshll.u32 %s964_s24, 4  ;;  %s181_s25 = int_to_ptr.vmem [resolvable:$true] %s180_s25 }
   0x9   : > { %s27_s27 = sadd.s32 1, %s958_s16  ;;  %s965_s28 = smov 64  }
   0xa   : > { %p708_p4 = pneg %p1029_p3  ;;  %p28_p6 = scmp.ge.s32.totalorder %s27_s27, 2 }
   0xb   : > { %s966_s29 = smov 4   ;;  %s164_s6 = sshll.u32 %s1106_s0, 4  ;;  %s165_s6 = int_to_ptr.hbm [resolvable:$true] %s164_s6 }
   0xc   : > { %p1037_p5 = pnand %p1025_p2, %p708_p4  ;;  %s1117_s27 = smov (%p28_p6, %s27_s27), 0 }
   0xd   : > { %s967_s7 = smov [#allocation2]   ;;  %s192_s11 = sshll.u32 %s1108_s2, 4  ;;  %s193_s11 = int_to_ptr.hbm [resolvable:$true] %s192_s11 }
   0xe   : > { %714 = dma.hbm_to_vmem [thread:$0]  (!%p1037_p5), %s179_s20, 2048, %s181_s25, [#allocation6], %s965_s28, %s965_s28, %s966_s29  }
   0xf   : > { %s166_s8 = sshll.u32 %s967_s7, 4  ;;  %s968_s12 = smov 128   ;;  %s167_s8 = int_to_ptr.vmem [resolvable:$true] %s166_s8 }
  0x10   : > { %s969_s13 = smov 8   ;;  %s970_s14 = smov [#allocation7]  }
  0x11   : > { %711 = dma.hbm_to_vmem [thread:$0]  (!%p1037_p5), %s165_s6, 256, %s167_s8, [#allocation3], %s968_s12, %s968_s12, %s969_s13  }
  0x12   : > { %s194_s18 = sshll.u32 %s970_s14, 4  ;;  %s206_s24 = sshll.u32 %s1109_s3, 4  ;;  %s195_s18 = int_to_ptr.vmem [resolvable:$true] %s194_s18  ;;  %s207_s24 = int_to_ptr.hbm [resolvable:$true] %s206_s24 }
  0x13   : > { %717 = dma.hbm_to_vmem [thread:$0]  (!%p1037_p5), %s193_s11, 2048, %s195_s18, [#allocation6], %s965_s28, %s965_s28, %s966_s29  }
  0x14   : > { %s971_s25 = smov [#allocation8]   ;;  %s972_s5 = smov 32  }
  0x15   : > { %s208_s30 = sshll.u32 %s971_s25, 4  ;;  %s973_s7 = smov 2   ;;  %s209_s30 = int_to_ptr.vmem [resolvable:$true] %s208_s30 }
  0x16   : > { %720 = dma.hbm_to_vmem [thread:$0]  (!%p1037_p5), %s207_s24, 64, %s209_s30, [#allocation9], %s972_s5, %s972_s5, %s973_s7  }
  0x17   : > { %224 = sbr.rel (%p1029_p3) target bundleno = 249 (0xf9), region = 36 }
  0x1c   : > { %937 = dma.done.wait (%p1025_p2), [#allocation3], 256  }
  0x1d   : > { %939 = vsyncadd (%p1025_p2), [#allocation3], 4294967040 }
  0x1e   : > { %941 = dma.done.wait (%p1025_p2), [#allocation6], 4096  }
  0x1f   : > { %943 = vsyncadd (%p1025_p2), [#allocation6], 4294963200 }
  0x20   : > { %945 = dma.done.wait (%p1025_p2), [#allocation9], 64  }
  0x21   : > { %947 = vsyncadd (%p1025_p2), [#allocation9], 4294967232  ;;  %p595_p7 = scmp.ne.s32.totalorder %s954_s15, 0 }
  0x23   : > { %261 = sbr.rel (%p595_p7) target bundleno = 43 (0x2b), region = 56 }
  0x28   : > { %v262_v0 = vld [vmem:[#allocation2] sm:$0xff]  ;;  %v263_v1 = vld [vmem:[#allocation2 + $0x8] sm:$0xff] }
  0x29   : > { %264 = vst [vmem:[#allocation10] sm:$0xff] %v262_v0 }
  0x2a   : > { %265 = vst [vmem:[#allocation10 + $0x8] sm:$0xff] %v263_v1 }
  0x2b PF: > { %s670_s23 = sshll.u32 %s954_s15, 6  ;;  %s599_s22 = sshll.u32 %s954_s15, 1 }
  0x2c   : > { %s288_s26 = scalar_lea.vmem [#allocation7], %s670_s23  ;;  %s1077_s28 = scalar_lea.vmem [#allocation5], %s670_s23 }
  0x2d   : > { %v687_v2 = vld [vmem:[%s288_s26 + $0x38] sm:$0xff]  ;;  %v686_v4 = vld [vmem:[%s288_s26 + $0x30] sm:$0xff]  ;;  %v685_v6 = vld [vmem:[%s288_s26 + $0x28] sm:$0xff]  ;;  %s306_s29 = scalar_lea.vmem [#allocation8], %s599_s22  ;;  %s974_s15 = smov [#allocation10]  }
  0x2e   : > { %v678_v3 = vld [vmem:[%s1077_s28 + $0x38] sm:$0xff]  ;;  %421 = vmatpush.bf16.msra.mxu1 %v687_v2  ;;  %v677_v5 = vld [vmem:[%s1077_s28 + $0x30] sm:$0xff]  ;;  %v676_v7 = vld [vmem:[%s1077_s28 + $0x28] sm:$0xff]  ;;  %s491_s6 = sshll.u32 %s974_s15, 4  ;;  %s493_s10 = sshll.u32 %s1110_s4, 4  ;;  %s492_s6 = int_to_ptr.vmem [resolvable:$true] %s491_s6  ;;  %s494_s10 = int_to_ptr.hbm [resolvable:$true] %s493_s10 }
  0x2f   : > { %358 = vmatpush.bf16.msra.mxu0 %v678_v3  ;;  %v684_v8 = vld [vmem:[%s288_s26 + $0x20] sm:$0xff]  ;;  %v683_v10 = vld [vmem:[%s288_s26 + $0x18] sm:$0xff]  ;;  %v682_v12 = vld [vmem:[%s288_s26 + $0x10] sm:$0xff]  ;;  %p729_p8 = scmp.eq.s32.totalorder %s584_s21, 1  ;;  %s975_s11 = smov 128  }
  0x30   : > { %v675_v9 = vld [vmem:[%s1077_s28 + $0x20] sm:$0xff]  ;;  %v674_v11 = vld [vmem:[%s1077_s28 + $0x18] sm:$0xff]  ;;  %v673_v13 = vld [vmem:[%s1077_s28 + $0x10] sm:$0xff]  ;;  %s976_s12 = smov 8  }
  0x31   : > { %v681_v14 = vld [vmem:[%s288_s26 + $0x8] sm:$0xff]  ;;  %v680_v16 = vld [vmem:[%s288_s26] sm:$0xff]  ;;  %v266_v17 = vld [vmem:[#allocation10] sm:$0xff] }
  0x32   : > { %422 = vmatpush.bf16.msra.mxu1 %v686_v4  ;;  %v672_v15 = vld [vmem:[%s1077_s28 + $0x8] sm:$0xff]  ;;  %v1086_v18 = vld [vmem:[#allocation10 + $0x8] sm:$0xff] }
  0x33   : > { %359 = vmatpush.bf16.msra.mxu0 %v677_v5  ;;  %v671_v19 = vld [vmem:[%s1077_s28] sm:$0xff]  ;;  %v308_v20 = vpack.c.bf16 %v1086_v18, %v266_v17 }
  0x34   : > { %v307_v21 = vld [vmem:[%s306_s29] sm:$0x3] }
  0x35   : > { %v372_v22 = vperm.slane %v307_v21, 1  ;;  %v309_v31 = vperm.slane %v307_v21, 0 }
  0x36   : > { %423 = vmatpush.bf16.msra.mxu1 %v685_v6 }
  0x37   : > { %360 = vmatpush.bf16.msra.mxu0 %v676_v7 }
  0x3a   : > { %424 = vmatpush.bf16.msra.mxu1 %v684_v8 }
  0x3b   : > { %361 = vmatpush.bf16.msra.mxu0 %v675_v9 }
  0x3e   : > { %425 = vmatpush.bf16.msra.mxu1 %v683_v10 }
  0x3f   : > { %362 = vmatpush.bf16.msra.mxu0 %v674_v11 }
  0x42   : > { %426 = vmatpush.bf16.msra.mxu1 %v682_v12 }
  0x43   : > { %363 = vmatpush.bf16.msra.mxu0 %v673_v13 }
  0x46   : > { %427 = vmatpush.bf16.msra.mxu1 %v681_v14 }
  0x47   : > { %364 = vmatpush.bf16.msra.mxu0 %v672_v15 }
  0x4a   : > { %428 = vmatpush.bf16.msra.mxu1 %v680_v16 }
  0x4b   : > { %365 = vmatpush.bf16.msra.mxu0 %v671_v19 }
  0x4d   : > { %429 = vmatmul.bf16.vlgmr.msra.gmra.mxu1 %v308_v20 }
  0x4e   : > { %366 = vmatmul.bf16.vlgmr.msra.gmra.mxu0 %v308_v20 }
  0xca   : > { %v430_v23 = vpop.f32.mrf.mxu1 }
  0xcb   : > { %v431_v24 = vadd.f32 %v430_v23, %v372_v22  ;;  %v367_v32 = vpop.f32.mrf.mxu0 }
  0xcc   : > { %v368_v34 = vadd.f32 %v367_v32, %v309_v31 }
  0xcd   : > { %v664_v25 = vmul.f32 -1.442695, %v431_v24 }
  0xce   : > { %v435_v39 = vmax.f32 %v368_v34, 0.0 }
  0xcf   : > { %768 = vpow2.f32 %v664_v25 }
  0xd0   : > { %v475_v45 = vsub.f32 %v266_v17, %v435_v39 }
  0xd2   : > { %v432_v26 = vpop.f32.mrf.mxu1 }
  0xd3   : > { %v433_v27 = vadd.f32 %v432_v26, %v372_v22  ;;  %v369_v43 = vpop.f32.mrf.mxu0 }
  0xd4   : > { %v370_v48 = vadd.f32 %v369_v43, %v309_v31 }
  0xd5   : > { %v769_v28 = vpop.eup %768  ;;  %v665_v29 = vmul.f32 -1.442695, %v433_v27 }
  0xd6   : > { %v443_v30 = vadd.f32 1.0, %v769_v28  ;;  %v436_v54 = vmax.f32 %v370_v48, 0.0 }
  0xd7   : > { %770 = vpow2.f32 %v665_v29 }
  0xd8   : > { %772 = vrcp.f32 %v443_v30  ;;  %v456_v40 = vand.u32 2147483648, %v443_v30  ;;  %v454_v42 = vand.u32 2147483647, %v443_v30  ;;  %vm450_vm1 = vweird.f32 %v443_v30 }
  0xd9   : > { %v476_v62 = vsub.f32 %v1086_v18, %v436_v54 }
  0xda   : > { %v457_v47 = vor.u32 1.1754944e-38, %v456_v40  ;;  %vm455_vm3 = vcmp.eq.f32.partialorder %v454_v42, 8.507059e+37 }
  0xdd   : > { %v771_v33 = vpop.eup %770 }
  0xde   : > { %v773_v35 = vpop.eup %772  ;;  %v444_v36 = vadd.f32 1.0, %v771_v33 }
  0xdf   : > { %v446_v37 = vmul.f32 %v773_v35, %v443_v30  ;;  %vm451_vm0 = vweird.f32 %v773_v35 }
  0xe0   : > { %774 = vrcp.f32 %v444_v36  ;;  %vm452_vm2 = vmor %vm450_vm1, %vm451_vm0  ;;  %v471_v55 = vand.u32 2147483648, %v444_v36  ;;  %v469_v58 = vand.u32 2147483647, %v444_v36  ;;  %vm465_vm5 = vweird.f32 %v444_v36 }
  0xe1   : > { %v447_v38 = vsub.f32 1.0, %v446_v37 }
  0xe2   : > { %v472_v60 = vor.u32 1.1754944e-38, %v471_v55  ;;  %vm470_vm7 = vcmp.eq.f32.partialorder %v469_v58, 8.507059e+37 }
  0xe3   : > { %v448_v41 = vmul.f32 %v773_v35, %v447_v38 }
  0xe5   : > { %v449_v44 = vadd.f32 %v773_v35, %v448_v41 }
  0xe6   : > { %v775_v46 = vpop.eup %774 }
  0xe7   : > { %v461_v49 = vmul.f32 %v775_v46, %v444_v36  ;;  %v453_v50 = vsel %vm452_vm2, %v773_v35, %v449_v44  ;;  %vm466_vm4 = vweird.f32 %v775_v46 }
  0xe8   : > { %v458_v51 = vsel %vm455_vm3, %v457_v47, %v453_v50  ;;  %vm467_vm6 = vmor %vm465_vm5, %vm466_vm4 }
  0xe9   : > { %v462_v52 = vsub.f32 1.0, %v461_v49  ;;  %v477_v53 = vmul.f32 %v475_v45, %v458_v51 }
  0xeb   : > { %v479_v56 = vadd.f32 %v477_v53, %v435_v39  ;;  %v463_v57 = vmul.f32 %v775_v46, %v462_v52 }
  0xed   : > { %481 = vst [vmem:[#allocation10] sm:$0xff] %v479_v56  ;;  %v464_v59 = vadd.f32 %v775_v46, %v463_v57 }
  0xef   : > { %v468_v61 = vsel %vm467_vm6, %v775_v46, %v464_v59 }
  0xf0   : > { %v473_v63 = vsel %vm470_vm7, %v472_v60, %v468_v61 }
  0xf1   : > { %v478_v0 = vmul.f32 %v476_v62, %v473_v63 }
  0xf3   : > { %v480_v1 = vadd.f32 %v478_v0, %v436_v54 }
  0xf5   : > { %482 = vst [vmem:[#allocation10 + $0x8] sm:$0xff] %v480_v1 }
  0xf6   : > { %705 = dma.vmem_to_hbm [thread:$0]  (%p729_p8), %s492_s6, 256, %s494_s10, [#allocation4], %s975_s11, %s975_s11, %s976_s12  }
  0xf7   : > { %949 = dma.done.wait (%p729_p8), [#allocation4], 256  }
  0xf8   : > { %951 = vsyncadd (%p729_p8), [#allocation4], 4294967040 }
  0xf9 PF: > { %s18_s17 = sadd.s32 1, %s962_s17   ;;  %s1114_s15 = smov %s958_s16 }
  0xfa   : > { %p15_p9 = scmp.ge.s32.totalorder %s18_s17, 4   ;;  %s1115_s16 = smov %s1117_s27 }
  0xfc   :  { %17 = sbr.rel (!%p15_p9) target bundleno = 5 (0x5), region = 86 }
 0x101   :  { %510 = vsyncpa [#allocation3], 1 }
 0x102   :  { %512 = vsyncpa [#allocation3 + $0x1], 1 }
 0x103   :  { %513 = vsyncpa [#allocation6], 1 }
 0x104   :  { %514 = vsyncpa [#allocation9], 1 }
 0x105   :  { %515 = vsyncpa [#allocation4], 1 }
 0x106   :  { %517 = vsyncpa [#allocation4 + $0x1], 1 }

</bundles_post_ra>
